<compile_context>
chip_gen: v7x
topology: tpu7x:2x2x1
jax: 0.10.0
libtpu: 0.0.40
codegen_flags: <defaults>
</compile_context>

<pallas_src>
import functools

import jax
import jax.numpy as jnp
from jax.experimental import pallas as pl
from jax.experimental.pallas import tpu as pltpu


def _round_up(v: int, m: int) -> int:
    return (v + m - 1) // m * m


def _pick_tm(n_pad: int, cap: int) -> int:
    # Prefer >= 2 row blocks so the "parallel" row axis can shard across the
    # two TensorCores on v7x. n_pad is always a multiple of 128.
    for cand in (512, 256, 128):
        if cand <= cap and n_pad % cand == 0 and n_pad // cand >= 2:
            return cand
    return 128  # n_pad == 128


def _pick_tk(n_pad: int, cap: int) -> int:
    for cand in (2048, 1024, 512, 256, 128):
        if cand <= cap and n_pad % cand == 0:
            return cand
    return 128  # n_pad is a multiple of 128


def _self_expression_kernel(c_ref, x_ref, o_ref, *, zero_diag: bool,
                            x_resident: bool):
    """One (i, j, k) grid step of y = C' @ x with C' = C or C minus its diagonal."""
    i = pl.program_id(0)   # output row block
    k = pl.program_id(2)   # reduction block (innermost grid axis)

    @pl.when(k == 0)
    def _():
        o_ref[...] = jnp.zeros_like(o_ref)

    c = c_ref[...]
    tm, tk = c.shape

    if zero_diag:
        # Zero the global diagonal of C before the matmul (cheap VPU select).
        # global_row == global_col  <=>  (col - row) == i*tm - k*tk.
        row = jax.lax.broadcasted_iota(jnp.int32, (tm, tk), 0)
        col = jax.lax.broadcasted_iota(jnp.int32, (tm, tk), 1)
        on_diag = (col - row) == (i * tm - k * tk)
        c = jnp.where(on_diag, jnp.zeros_like(c), c)

    if x_resident:
        # x is the whole (n_pad, d_pad) array, resident in VMEM; take the slab
        # matching this reduction block.
        start = pl.multiple_of(k * tk, tk)
        x = x_ref[pl.ds(start, tk), :]
    else:
        x = x_ref[...]

    # Accumulate directly into the f32 output block (resident across k).
    o_ref[...] += jnp.dot(c, x, preferred_element_type=jnp.float32)


def self_expression(coefficient: jax.Array, x: jax.Array, diag: bool = True,
                    *, compute_dtype=jnp.float32, max_tm: int = 512,
                    max_tk: int = 1024,
                    resident_limit_bytes: int = 8 << 20) -> jax.Array:
    """Pallas equivalent of SelfExpression.forward(x, diag).

    coefficient: [n, n]   x: [n, d]   returns [n, d] float32.
    """
    n, n2 = coefficient.shape
    assert n == n2, "Coefficient must be square"
    assert x.shape[0] == n, "x rows must match Coefficient size"
    assert max_tm >= 128 and max_tk >= 128
    d = x.shape[1]

    # Tiny problems: fixed per-grid-step overhead + masked lane stores make a
    # kernel slower than plain XLA; dispatch directly.
    if n < 128:
        c = coefficient.astype(jnp.float32)
        if not diag:
            c = c - jnp.diag(jnp.diag(c))
        return jnp.dot(c, x.astype(jnp.float32),
                       preferred_element_type=jnp.float32)

    compute_dtype = jnp.dtype(compute_dtype)
    itemsize = compute_dtype.itemsize

    n_pad = _round_up(n, 128)
    tm = _pick_tm(n_pad, max_tm)
    tk = _pick_tk(n_pad, max_tk)

    d_pad0 = _round_up(d, 128)           # lane-dense output slab
    x_resident = n_pad * d_pad0 * itemsize <= resident_limit_bytes
    if x_resident or d_pad0 <= 1024:
        d_tile, d_pad = d_pad0, d_pad0   # single d block
    else:
        d_tile, d_pad = 512, _round_up(d, 512)   # d-tiled, streamed x

    c_p = coefficient.astype(compute_dtype)
    x_p = x.astype(compute_dtype)
    if n_pad != n:
        c_p = jnp.pad(c_p, ((0, n_pad - n), (0, n_pad - n)))
        x_p = jnp.pad(x_p, ((0, n_pad - n), (0, 0)))
    if d_pad != d:
        x_p = jnp.pad(x_p, ((0, 0), (0, d_pad - d)))

    n_rows, n_d, n_k = n_pad // tm, d_pad // d_tile, n_pad // tk
    grid = (n_rows, n_d, n_k)

    if x_resident:
        # Constant index map: DMA'd from HBM exactly once, stays in VMEM.
        x_spec = pl.BlockSpec((n_pad, d_pad), lambda i, j, k: (0, 0))
    else:
        x_spec = pl.BlockSpec((tk, d_tile), lambda i, j, k: (k, j))

    # Explicit VMEM budget: double-buffered blocks + elementwise-mask temporaries.
    c_buf = 2 * tm * tk * itemsize
    x_buf = 2 * (n_pad * d_pad if x_resident else tk * d_tile) * itemsize
    o_buf = 2 * tm * d_tile * 4
    tmp_buf = (6 * tm * tk * 4) if not diag else 0
    budget = c_buf + x_buf + o_buf + tmp_buf
    vmem_limit = min(max(int(budget * 1.25) + (4 << 20), 32 << 20), 64 << 20)

    bytes_accessed = (n_d * n_pad * n_pad * itemsize                      # C (re-read per d block)
                      + (1 if x_resident else n_rows) * n_pad * d_pad * itemsize  # x
                      + n_pad * d_pad * 4)                                # y

    kernel = functools.partial(_self_expression_kernel,
                               zero_diag=not diag, x_resident=x_resident)

    out = pl.pallas_call(
        kernel,
        out_shape=jax.ShapeDtypeStruct((n_pad, d_pad), jnp.float32),
        grid_spec=pl.GridSpec(
            grid=grid,
            in_specs=[
                pl.BlockSpec((tm, tk), lambda i, j, k: (i, k)),   # C tile
                x_spec,                                           # x
            ],
            out_specs=pl.BlockSpec((tm, d_tile), lambda i, j, k: (i, j)),
        ),
        compiler_params=pltpu.CompilerParams(
            dimension_semantics=("parallel", "parallel", "arbitrary"),
            vmem_limit_bytes=vmem_limit,
        ),
        cost_estimate=pl.CostEstimate(
            flops=2 * n_pad * n_pad * d_pad,
            transcendentals=0,
            bytes_accessed=bytes_accessed,
        ),
    )(c_p, x_p)

    if n_pad != n or d_pad != d:
        out = out[:n, :d]
    return out


if __name__ == "__main__":
    key = jax.random.PRNGKey(0)
    k1, k2 = jax.random.split(key)
    hi = jax.lax.Precision.HIGHEST

    # ---- 1) Module-sized problem: resident x, 2 row blocks (megacore) ----
    n, d = 512, 128
    coefficient = 1e-8 * jnp.ones((n, n), dtype=jnp.float32)   # module init
    x = jax.random.normal(k1, (n, d), dtype=jnp.float32)

    y_true = jax.block_until_ready(self_expression(coefficient, x, diag=True))
    y_false = jax.block_until_ready(self_expression(coefficient, x, diag=False))
    ref_true = jnp.dot(coefficient, x, precision=hi)
    ref_false = jnp.dot(coefficient - jnp.diag(jnp.diag(coefficient)), x, precision=hi)
    assert y_true.shape == (n, d) and y_true.dtype == jnp.float32
    assert jnp.allclose(y_true, ref_true, atol=1e-6, rtol=1e-6)
    assert jnp.allclose(y_false, ref_false, atol=1e-6, rtol=1e-6)

    # ---- 2) Random C, small reduction tile -> multi-step k accumulation and
    #         rectangular (tm=256, tk=128) diagonal masking ----
    c_rand = jax.random.normal(k2, (n, n), dtype=jnp.float32)
    y_r = jax.block_until_ready(self_expression(c_rand, x, diag=False, max_tk=128))
    ref_r = jnp.dot(c_rand - jnp.diag(jnp.diag(c_rand)), x, precision=hi)
    assert jnp.allclose(y_r, ref_r, atol=1e-3, rtol=1e-3)

    # ---- 3) Large-d path: streamed x + d-tiled grid (resident disabled) ----
    n3, d3 = 256, 1100
    c3 = jax.random.normal(k2, (n3, n3), dtype=jnp.float32)
    x3 = jax.random.normal(k1, (n3, d3), dtype=jnp.float32)
    y3 = jax.block_until_ready(
        self_expression(c3, x3, diag=False, resident_limit_bytes=0))
    ref3 = jnp.dot(c3 - jnp.diag(jnp.diag(c3)), x3, precision=hi)
    assert y3.shape == (n3, d3)
    assert jnp.allclose(y3, ref3, atol=1e-3, rtol=1e-3)

    # ---- 4) Unaligned n and d (zero padding is exact) ----
    n4, d4 = 200, 32
    c4 = jax.random.normal(k2, (n4, n4), dtype=jnp.float32)
    x4 = jax.random.normal(k1, (n4, d4), dtype=jnp.float32)
    y4 = jax.block_until_ready(self_expression(c4, x4, diag=False))
    ref4 = jnp.dot(c4 - jnp.diag(jnp.diag(c4)), x4, precision=hi)
    assert y4.shape == (n4, d4)
    assert jnp.allclose(y4, ref4, atol=1e-3, rtol=1e-3)

    # ---- 5) Tiny module shapes route to the plain-jnp fast path ----
    n5, d5 = 8, 32
    c5 = 1e-8 * jnp.ones((n5, n5), dtype=jnp.float32)
    x5 = jax.random.normal(k1, (n5, d5), dtype=jnp.float32)
    y5 = jax.block_until_ready(self_expression(c5, x5, diag=False))
    ref5 = jnp.dot(c5 - jnp.diag(jnp.diag(c5)), x5, precision=hi)
    assert jnp.allclose(y5, ref5, atol=1e-6, rtol=1e-6)

    # ---- 6) Optional bf16 compute path (halves C's HBM traffic) ----
    y_b = jax.block_until_ready(
        self_expression(c_rand, x, diag=False, compute_dtype=jnp.bfloat16))
    c_b = c_rand.astype(jnp.bfloat16).astype(jnp.float32)
    x_b = x.astype(jnp.bfloat16).astype(jnp.float32)
    ref_b = jnp.dot(c_b - jnp.diag(jnp.diag(c_b)), x_b, precision=hi)
    assert jnp.allclose(y_b, ref_b, atol=1e-2, rtol=1e-2)

    print("KERNEL_OK")
</pallas_src>

<mosaic_0001>
module attributes {stable_mosaic.version = 11 : i64} {
  func.func @_self_expression_kernel(%arg0: i32, %arg1: i32, %arg2: i32, %arg3: memref<256x512xf32, #tpu.memory_space<vmem>>, %arg4: memref<512x128xf32, #tpu.memory_space<vmem>>, %arg5: memref<256x128xf32, #tpu.memory_space<vmem>>) attributes {dimension_semantics = [#tpu.dimension_semantics<parallel>, #tpu.dimension_semantics<parallel>, #tpu.dimension_semantics<arbitrary>], iteration_bounds = array<i64: 2, 1, 1>, scalar_prefetch = 0 : i64, scratch_operands = 0 : i64, tpu.core_type = #tpu.core_type<tc>, window_params = [{transform_indices = @transform_0, window_bounds = array<i64: 256, 512>}, {pipeline_mode = #tpu.pipeline_mode<synchronous>, transform_indices = @transform_1, window_bounds = array<i64: 512, 128>}, {transform_indices = @transform_2, window_bounds = array<i64: 256, 128>}]} {
    %c0_i32 = arith.constant 0 : i32
    %0 = arith.cmpi eq, %arg2, %c0_i32 : i32
    %1 = arith.extui %0 : i1 to i32
    %c0_i32_0 = arith.constant 0 : i32
    %2 = arith.cmpi ne, %1, %c0_i32_0 : i32
    scf.if %2 {
      %cst_7 = arith.constant 0.000000e+00 : f32
      %12 = vector.broadcast %cst_7 : f32 to vector<256x128xf32>
      %c0_8 = arith.constant 0 : index
      %c0_9 = arith.constant 0 : index
      %13 = vector.load %arg5[%c0_8, %c0_9] : memref<256x128xf32, #tpu.memory_space<vmem>>, vector<256x128xf32>
      tpu.vector_store %arg5[%c0_8, %c0_9], %12 {strides = array<i32>} : memref<256x128xf32, #tpu.memory_space<vmem>>, vector<256x128xf32>,
    } else {
    }
    %c0 = arith.constant 0 : index
    %c0_1 = arith.constant 0 : index
    %3 = vector.load %arg3[%c0, %c0_1] : memref<256x512xf32, #tpu.memory_space<vmem>>, vector<256x512xf32>
    %c512_i32 = arith.constant 512 : i32
    %4 = arith.muli %arg2, %c512_i32 : i32
    %5 = tpu.assume_multiple %4, 512 : i32
    %6 = arith.index_cast %5 : i32 to index
    %c0_2 = arith.constant 0 : index
    %7 = vector.load %arg4[%6, %c0_2] : memref<512x128xf32, #tpu.memory_space<vmem>>, vector<512x128xf32>
    %c0_3 = arith.constant 0 : index
    %c0_4 = arith.constant 0 : index
    %8 = vector.load %arg5[%c0_3, %c0_4] : memref<256x128xf32, #tpu.memory_space<vmem>>, vector<256x128xf32>
    %cst = arith.constant dense<0.000000e+00> : vector<256x128xf32>
    %9 = tpu.matmul %3, %7, %cst {dimension_numbers = #tpu.dot_dimension_numbers<[1], [0], [0], [1], [0, 0, 1, 1], [], []>} : vector<256x512xf32>, vector<512x128xf32>, vector<256x128xf32> -> vector<256x128xf32>
    %10 = arith.addf %8, %9 : vector<256x128xf32>
    %c0_5 = arith.constant 0 : index
    %c0_6 = arith.constant 0 : index
    %11 = vector.load %arg5[%c0_5, %c0_6] : memref<256x128xf32, #tpu.memory_space<vmem>>, vector<256x128xf32>
    tpu.vector_store %arg5[%c0_5, %c0_6], %10 {strides = array<i32>} : memref<256x128xf32, #tpu.memory_space<vmem>>, vector<256x128xf32>,
    return
  }
  func.func @transform_0(%arg0: i32, %arg1: i32, %arg2: i32) -> (i32, i32) {
    %c0_i32 = arith.constant 0 : i32
    return %arg0, %arg2 : i32, i32
  }
  func.func @transform_1(%arg0: i32, %arg1: i32, %arg2: i32) -> (i32, i32) {
    %c0_i32 = arith.constant 0 : i32
    %c0_i32_0 = arith.constant 0 : i32
    %c0_i32_1 = arith.constant 0 : i32
    return %c0_i32, %c0_i32_0 : i32, i32
  }
  func.func @transform_2(%arg0: i32, %arg1: i32, %arg2: i32) -> (i32, i32) {
    %c0_i32 = arith.constant 0 : i32
    return %arg0, %arg1 : i32, i32
  }
}

</mosaic_0001>

<bundles_post_ra>
// kernel: tpu_custom_call.1
= control target key start
LH: loop header
LB: loop body
LE: loop exit
PB: predicated region body
PF: predicated region fallthrough
CT: control target
= control target key end

     0   :  { %7 = vsyncpa [#allocation3], 0  ;;  %s1884_s0 = inlined_call_operand.hbm [shape: f32[512,512], index: 0, kind: input, shape index: {}]   ;;  %s1885_s1 = inlined_call_operand.hbm [shape: f32[512,128], index: 1, kind: input, shape index: {}]   ;;  %s1886_s2 = inlined_call_operand.hbm [shape: f32[512,128], index: 2, kind: output, shape index: {}]  }
   0x1   :  { %9 = vsyncpa [#allocation3 + $0x1], 0 }
   0x2   :  { %10 = vsyncpa [#allocation6], 0 }
   0x3   :  { %11 = vsyncpa [#allocation4], 0 }
   0x4   :  { %13 = vsyncpa [#allocation4 + $0x1], 0  ;;  %s1467_s9 = smov 0   ;;  %s1469_s10 = smov 0  }
   0x5   :  { %s1471_s11 = smov 0   ;;  %s1473_s12 = smov 0  }
   0x6   :  { %s1475_s13 = smov 0   ;;  %s1477_s14 = smov 0  }
   0x7 LB: > { %s1098_s15 = sadd.s32 4294967295, %s1440_s14   ;;  %s1099_s16 = sadd.s32 4294967294, %s1440_s14   ;;  %s1440_s14 = sphi %s1477_s14, %s19_s14   ;;  %s1436_s13 = sphi %s1475_s13, %s1910_s13   ;;  %s1432_s12 = sphi %s1473_s12, %s1909_s12   ;;  %s1428_s11 = sphi %s1471_s11, %s1908_s11   ;;  %s1424_s10 = sphi %s1469_s10, %s1907_s10   ;;  %s1420_s9 = sphi %s1467_s9, %s1906_s9  }
   0x8   : > { %p60_p0 = scmp.ne.s32.totalorder %s1424_s10, %s1420_s9  ;;  %p1501_p1 = scmp.eq.s32.totalorder %s1098_s15, 0 }
   0x9   : > { %p1505_p2 = scmp.eq.s32.totalorder %s1098_s15, 1  ;;  %p113_p3 = scmp.eq.s32.totalorder %s1099_s16, 1 }
   0xa   : > { %s1891_s17 = scalar_select %p1501_p1, 1, 0 }
   0xb   : > { %s1892_s18 = scalar_select %p1505_p2, 1, 0 }
   0xc   : > { %p1511_p4 = por %p1501_p1, %p60_p0  ;;  %p1100_p5 = scmp.ge.s32.totalorder %s1440_s14, 1 }
   0xd   : > { %p1516_p6 = por %p113_p3, %p60_p0  ;;  %p120_p7 = scmp.lt.s32.totalorder %s1440_s14, 3 }
   0xe   : > { %s1893_s19 = scalar_select %p1511_p4, 1, 0 }
   0xf   : > { %s1894_s20 = scalar_select %p1516_p6, 1, 0 }
  0x10   : > { %p1521_p8 = pnand %p1100_p5, %p120_p7  ;;  %s1442_s22 = smov [#allocation5]  }
  0x11   : > { %s132_s23 = sshll.u32 %s1442_s22, 4  ;;  %s38_s25 = sadd.s32 1, %s1436_s13  ;;  %s133_s23 = int_to_ptr.vmem [resolvable:$true] %s132_s23 }
  0x12   : > { %s1895_s21 = scalar_select %p1521_p8, 1, 0 }
  0x13   : > { %p1223_p9 = pneg %p1521_p8  ;;  %s1296_s28 = scalar_lea.hbm %s1885_s1, 8192 }
  0x14   : > { %p1297_p12 = scmp.ne.s32.totalorder %s1885_s1, %s1296_s28  ;;  %p1303_p5 = scmp.lt.u32.totalorder %s1296_s28, %s1885_s1 }
  0x15   : > { %p1530_p11 = pnand %p1223_p9, %p1501_p1 }
  0x17   : > { %p1298_p13 = pneg %p1530_p11 }
  0x19   : > { %p1299_p0 = pnand %p1298_p13, %p1297_p12 }
  0x1b   : > { %p1300_p3 = pneg %p1299_p0 }
  0x1d   : > { %p1305_p7 = pnand %p1303_p5, %p1300_p3 }
  0x1f   : > { %1308 = shalt.err (!%p1305_p7)
}
  0x20   : > { %s1309_s5 = scalar_lea.vmem %s133_s23, 8192  ;;  %p1317_p1 = scmp.lt.s32.totalorder %s133_s23, %s133_s23 }
  0x21   : > { %p1310_p9 = scmp.ne.s32.totalorder %s133_s23, %s1309_s5  ;;  %p1318_p4 = scmp.lt.s32.totalorder %s1309_s5, %s1309_s5 }
  0x23   : > { %p1312_p10 = pnand %p1310_p9, %p1298_p13  ;;  %p1319_p8 = por %p1318_p4, %p1317_p1 }
  0x25   : > { %p1313_p6 = pneg %p1312_p10 }
  0x27   : > { %p1320_p2 = pnand %p1319_p8, %p1313_p6 }
  0x29   : > { %1323 = shalt.err (!%p1320_p2)
}
  0x2a   : > { %s1443_s6 = smov 128   ;;  %s1444_s7 = smov 8  }
  0x2b   : > { %1226 = dma.hbm_to_vmem [thread:$0]  (!%p1530_p11), %s1885_s1, 8192, %s133_s23, [#allocation6], %s1443_s6, %s1443_s6, %s1444_s7  }
  0x2c   : > { %p40_p1 = scmp.ge.s32.totalorder %s38_s25, 2  ;;  %s47_s16 = sadd.s32 1, %s1428_s11 }
  0x2d   : > { %p54_p2 = scmp.ne.s32.totalorder %s1428_s11, %s1424_s10  ;;  %p55_p4 = scmp.eq.s32.totalorder %s1440_s14, 0 }
  0x2e   : > { %s1912_s25 = smov (%p40_p1, %s38_s25), 0  ;;  %p1898_p8 = scmp.ne.s32.totalorder %s1892_s18, 0 }
  0x2f   : > { %p1557_p6 = por %p55_p4, %p54_p2  ;;  %s42_s24 = ssub.s32 %s1436_s13, %s1912_s25 }
  0x30   : > { %p1563_p10 = por %p1898_p8, %p54_p2  ;;  %p1236_p12 = scmp.lt.s32.totalorder %s1440_s14, 2 }
  0x31   : > { %p45_p11 = scmp.eq.s32.totalorder %s42_s24, 0  ;;  %s146_s23 = sand.u32 1, %s1428_s11  }
  0x32   : > { %s1103_s27 = sshll.u32 %s146_s23, 10  ;;  %s1117_s29 = sshll.u32 %s1436_s13, 14 }
  0x33   : > { %s1572_s28 = scalar_select %p45_p11, %s1428_s11, %s47_s16  }
  0x34   : > { %s1578_s4 = scalar_lea.hbm %s1884_s0, %s1117_s29  ;;  %s150_s18 = scalar_lea.vmem [#allocation2], %s1103_s27 }
  0x35   : > { %s160_s5 = sshll.u32 %s150_s18, 4  ;;  %p1584_p13 = pnand %p1236_p12, %p1557_p6  ;;  %s1580_s5 = int_to_ptr.vmem [resolvable:$true] %s160_s5 }
  0x36   : > { %s1588_s7 = scalar_lea.sflag [#allocation3], %s146_s23  ;;  %s1324_s8 = scalar_lea.hbm %s1578_s4, 16384 }
  0x37   : > { %p1325_p0 = scmp.ne.s32.totalorder %s1578_s4, %s1324_s8  ;;  %p1326_p3 = pneg %p1584_p13 }
  0x38   : > { %s1329_s22 = scalar_lea.hbm %s1884_s0, 32768  ;;  %p1330_p9 = scmp.lt.u32.totalorder %s1578_s4, %s1884_s0 }
  0x39   : > { %p1327_p5 = pnand %p1326_p3, %p1325_p0  ;;  %p1331_p1 = scmp.lt.u32.totalorder %s1329_s22, %s1324_s8 }
  0x3a   : > { %p1333_p4 = scmp.lt.u32.totalorder %s1324_s8, %s1578_s4 }
  0x3b   : > { %p1328_p7 = pneg %p1327_p5  ;;  %p1332_p2 = por %p1331_p1, %p1330_p9 }
  0x3d   : > { %p1334_p6 = por %p1333_p4, %p1332_p2 }
  0x3f   : > { %p1335_p8 = pnand %p1334_p6, %p1328_p7 }
  0x41   : > { %1338 = shalt.err (!%p1335_p8)
}
  0x42   : > { %s1339_s23 = scalar_lea.vmem %s1580_s5, 16384  ;;  %s1445_s29 = smov [#allocation2]  }
  0x43   : > { %p1340_p12 = scmp.ne.s32.totalorder %s1580_s5, %s1339_s23  ;;  %s1344_s30 = sshll.u32 %s1445_s29, 4  ;;  %s1345_s30 = int_to_ptr.vmem [resolvable:$false] %s1344_s30 }
  0x44   : > { %s1346_s3 = scalar_lea.vmem %s1345_s30, 32768  ;;  %p1347_p5 = scmp.lt.s32.totalorder %s1580_s5, %s1345_s30 }
  0x45   : > { %p1342_p11 = pnand %p1340_p12, %p1326_p3  ;;  %p1348_p9 = scmp.lt.s32.totalorder %s1346_s3, %s1339_s23 }
  0x47   : > { %p1343_p0 = pneg %p1342_p11  ;;  %p1349_p1 = por %p1348_p9, %p1347_p5 }
  0x49   : > { %p1350_p2 = pnand %p1349_p1, %p1343_p0 }
  0x4b   : > { %1353 = shalt.err (!%p1350_p2)
}
  0x4c   : > { %s1446_s18 = smov 512   ;;  %s1447_s8 = smov 32  }
  0x4d   : > { %1230 = dma.hbm_to_vmem [thread:$0]  (!%p1584_p13), %s1578_s4, 16384, %s1580_s5, %s1588_s7, %s1446_s18, %s1446_s18, %s1447_s8  }
  0x4e   : > { %p1901_p3 = scmp.ne.s32.totalorder %s1895_s21, 0 }
  0x4f   : > { %s1619_s15 = sand.u32 (!%p1901_p3), 1, %s1424_s10   ;;  %p1902_p7 = scmp.ne.s32.totalorder (!%p1901_p3), %s1893_s19, 0 }
  0x50   : > { %172 = sbr.rel (%p1901_p3) target bundleno = 511 (0x1ff), region = 28  ;;  %s1108_s16 = sshll.u32 (!%p1901_p3), %s1619_s15, 10 }
  0x51   : > { %s175_s22 = scalar_lea.sflag (!%p1901_p3), [#allocation3], %s1619_s15  ;;  %s1623_s24 = scalar_lea.vmem (!%p1901_p3), [#allocation2], %s1108_s16 }
  0x57   : > { %1407 = dma.done.wait (%p1902_p7), %s175_s22, 16384  }
  0x58   : > { %1409 = vsyncadd (%p1902_p7), %s175_s22, 4294950912  ;;  %p1903_p13 = scmp.ne.s32.totalorder %s1891_s17, 0 }
  0x5a   : > { %1411 = dma.done.wait (%p1903_p13), [#allocation6], 8192  }
  0x5b   : > { %1413 = vsyncadd (%p1903_p13), [#allocation6], 4294959104  ;;  %v1448_v0 = vmov 0.0|0.0   ;;  %v372_v1 = vld [vmem:[#allocation5] sm:$0xff]  ;;  %v373_v2 = vld [vmem:[#allocation5 + $0x8] sm:$0xff]  ;;  %s1110_s17 = sshll.u32 %s1619_s15, 8 }
  0x5c   : > { %1119 = vmatprep.subr.bf16.mxu0 %v1448_v0  ;;  %1167 = vmatprep.subr.bf16.mxu1 %v1448_v0  ;;  %v404_v3 = vld [vmem:[#allocation5 + $0x100] sm:$0xff]  ;;  %v1120_v4 = vpack.c.bf16 %v373_v2, %v372_v1  ;;  %v405_v5 = vld [vmem:[#allocation5 + $0x108] sm:$0xff]  ;;  %v374_v6 = vld [vmem:[#allocation5 + $0x10] sm:$0xff]  ;;  %s1794_s19 = scalar_lea.vmem [#allocation7], %s1110_s17  ;;  %s1118_s21 = sshll.u32 %s1432_s12, 12 }
  0x5d   : > { %v375_v7 = vld [vmem:[#allocation5 + $0x18] sm:$0xff]  ;;  %v1168_v8 = vpack.c.bf16 %v405_v5, %v404_v3  ;;  %v406_v9 = vld [vmem:[#allocation5 + $0x110] sm:$0xff]  ;;  %v376_v13 = vld [vmem:[#allocation5 + $0x20] sm:$0xff]  ;;  %s997_s4 = sshll.u32 %s1794_s19, 4  ;;  %s1832_s7 = scalar_lea.hbm %s1886_s2, %s1118_s21  ;;  %s1834_s4 = int_to_ptr.vmem [resolvable:$true] %s997_s4 }
  0x5e   : > { %v407_v10 = vld [vmem:[#allocation5 + $0x118] sm:$0xff]  ;;  %1121 = vmatpush1.bf16.msra.mxu0 %v1120_v4  ;;  %v1123_v11 = vpack.c.bf16 %v375_v7, %v374_v6  ;;  %v377_v14 = vld [vmem:[#allocation5 + $0x28] sm:$0xff]  ;;  %v408_v15 = vld [vmem:[#allocation5 + $0x120] sm:$0xff]  ;;  %s983_s27 = scalar_lea.sflag [#allocation4], %s1619_s15  ;;  %s1354_s23 = scalar_lea.vmem %s1834_s4, 4096 }
  0x5f   : > { %1169 = vmatpush1.bf16.msra.mxu1 %v1168_v8  ;;  %1122 = vmatprep.subr.bf16.mxu0 %v1448_v0  ;;  %v1171_v12 = vpack.c.bf16 %v407_v10, %v406_v9  ;;  %v409_v16 = vld [vmem:[#allocation5 + $0x128] sm:$0xff]  ;;  %v1126_v17 = vpack.c.bf16 %v377_v14, %v376_v13  ;;  %v378_v19 = vld [vmem:[#allocation5 + $0x30] sm:$0xff]  ;;  %v379_v20 = vld [vmem:[#allocation5 + $0x38] sm:$0xff]  ;;  %p1355_p4 = scmp.ne.s32.totalorder %s1834_s4, %s1354_s23  ;;  %s1449_s12 = smov [#allocation7]  }
  0x60   : > { %1170 = vmatprep.subr.bf16.mxu1 %v1448_v0  ;;  %v1174_v18 = vpack.c.bf16 %v409_v16, %v408_v15  ;;  %v410_v21 = vld [vmem:[#allocation5 + $0x130] sm:$0xff]  ;;  %v411_v22 = vld [vmem:[#allocation5 + $0x138] sm:$0xff]  ;;  %v1129_v23 = vpack.c.bf16 %v379_v20, %v378_v19  ;;  %v380_v25 = vld [vmem:[#allocation5 + $0x40] sm:$0xff]  ;;  %s1358_s29 = sshll.u32 %s1449_s12, 4  ;;  %s1359_s29 = int_to_ptr.vmem [resolvable:$false] %s1358_s29 }
  0x61   : > { %v1177_v24 = vpack.c.bf16 %v411_v22, %v410_v21  ;;  %v381_v26 = vld [vmem:[#allocation5 + $0x48] sm:$0xff]  ;;  %v412_v27 = vld [vmem:[#allocation5 + $0x140] sm:$0xff]  ;;  %v382_v31 = vld [vmem:[#allocation5 + $0x50] sm:$0xff]  ;;  %p1356_p6 = pnand %p1355_p4, %p1563_p10  ;;  %s1360_s30 = scalar_lea.vmem %s1359_s29, 8192 }
  0x62   : > { %1124 = vmatpush1.bf16.msra.mxu0 %v1123_v11  ;;  %v413_v28 = vld [vmem:[#allocation5 + $0x148] sm:$0xff]  ;;  %v1132_v29 = vpack.c.bf16 %v381_v26, %v380_v25  ;;  %v383_v32 = vld [vmem:[#allocation5 + $0x58] sm:$0xff]  ;;  %v414_v33 = vld [vmem:[#allocation5 + $0x150] sm:$0xff]  ;;  %p1361_p12 = scmp.lt.s32.totalorder %s1834_s4, %s1359_s29  ;;  %p1362_p11 = scmp.lt.s32.totalorder %s1360_s30, %s1354_s23 }
  0x63   : > { %1172 = vmatpush1.bf16.msra.mxu1 %v1171_v12  ;;  %1125 = vmatprep.subr.bf16.mxu0 %v1448_v0  ;;  %v1180_v30 = vpack.c.bf16 %v413_v28, %v412_v27  ;;  %v415_v34 = vld [vmem:[#allocation5 + $0x158] sm:$0xff]  ;;  %v1135_v35 = vpack.c.bf16 %v383_v32, %v382_v31  ;;  %v384_v37 = vld [vmem:[#allocation5 + $0x60] sm:$0xff]  ;;  %v385_v38 = vld [vmem:[#allocation5 + $0x68] sm:$0xff]  ;;  %p1357_p8 = pneg %p1356_p6 }
  0x64   : > { %1173 = vmatprep.subr.bf16.mxu1 %v1448_v0  ;;  %v1183_v36 = vpack.c.bf16 %v415_v34, %v414_v33  ;;  %v416_v39 = vld [vmem:[#allocation5 + $0x160] sm:$0xff]  ;;  %v417_v40 = vld [vmem:[#allocation5 + $0x168] sm:$0xff]  ;;  %v245_v42 = vld [vmem:[%s1623_s24 + $0x18] sm:$0xff]  ;;  %v1138_v43 = vpack.c.bf16 %v385_v38, %v384_v37  ;;  %p1363_p0 = por %p1362_p11, %p1361_p12 }
  0x65   : > { %v243_v41 = vld [vmem:[%s1623_s24 + $0x8] sm:$0xff]  ;;  %757 = vmatprep.mubr.f32.mxu1 %v245_v42  ;;  %v1186_v44 = vpack.c.bf16 %v417_v40, %v416_v39  ;;  %v386_v45 = vld [vmem:[#allocation5 + $0x70] sm:$0xff]  ;;  %v387_v46 = vld [vmem:[#allocation5 + $0x78] sm:$0xff] }
  0x66   : > { %1127 = vmatpush1.bf16.msra.mxu0 %v1126_v17  ;;  %532 = vmatprep.mubr.f32.mxu0 %v243_v41  ;;  %v418_v47 = vld [vmem:[#allocation5 + $0x170] sm:$0xff]  ;;  %v419_v48 = vld [vmem:[#allocation5 + $0x178] sm:$0xff]  ;;  %v1141_v49 = vpack.c.bf16 %v387_v46, %v386_v45  ;;  %v388_v51 = vld [vmem:[#allocation5 + $0x80] sm:$0xff]  ;;  %p1364_p5 = pnand %p1363_p0, %p1357_p8 }
  0x67   : > { %1175 = vmatpush1.bf16.msra.mxu1 %v1174_v18  ;;  %1128 = vmatprep.subr.bf16.mxu0 %v1448_v0  ;;  %v1189_v50 = vpack.c.bf16 %v419_v48, %v418_v47  ;;  %v389_v52 = vld [vmem:[#allocation5 + $0x88] sm:$0xff]  ;;  %v420_v53 = vld [vmem:[#allocation5 + $0x180] sm:$0xff]  ;;  %v390_v57 = vld [vmem:[#allocation5 + $0x90] sm:$0xff] }
  0x68   : > { %1176 = vmatprep.subr.bf16.mxu1 %v1448_v0  ;;  %v421_v54 = vld [vmem:[#allocation5 + $0x188] sm:$0xff]  ;;  %v1144_v55 = vpack.c.bf16 %v389_v52, %v388_v51  ;;  %v391_v58 = vld [vmem:[#allocation5 + $0x98] sm:$0xff]  ;;  %v422_v59 = vld [vmem:[#allocation5 + $0x190] sm:$0xff] }
  0x69   : > { %v1192_v56 = vpack.c.bf16 %v421_v54, %v420_v53  ;;  %v423_v60 = vld [vmem:[#allocation5 + $0x198] sm:$0xff]  ;;  %v1147_v61 = vpack.c.bf16 %v391_v58, %v390_v57  ;;  %v392_v63 = vld [vmem:[#allocation5 + $0xa0] sm:$0xff]  ;;  %v393_v1 = vld [vmem:[#allocation5 + $0xa8] sm:$0xff] }
  0x6a   : > { %1130 = vmatpush1.bf16.msra.mxu0 %v1129_v23  ;;  %v1195_v62 = vpack.c.bf16 %v423_v60, %v422_v59  ;;  %v424_v2 = vld [vmem:[#allocation5 + $0x1a0] sm:$0xff]  ;;  %v425_v3 = vld [vmem:[#allocation5 + $0x1a8] sm:$0xff]  ;;  %v1150_v4 = vpack.c.bf16 %v393_v1, %v392_v63  ;;  %v394_v6 = vld [vmem:[#allocation5 + $0xb0] sm:$0xff] }
  0x6b   : > { %1178 = vmatpush1.bf16.msra.mxu1 %v1177_v24  ;;  %1131 = vmatprep.subr.bf16.mxu0 %v1448_v0  ;;  %v1198_v5 = vpack.c.bf16 %v425_v3, %v424_v2  ;;  %v395_v7 = vld [vmem:[#allocation5 + $0xb8] sm:$0xff]  ;;  %v426_v8 = vld [vmem:[#allocation5 + $0x1b0] sm:$0xff]  ;;  %v396_v12 = vld [vmem:[#allocation5 + $0xc0] sm:$0xff] }
  0x6c   : > { %1179 = vmatprep.subr.bf16.mxu1 %v1448_v0  ;;  %v427_v9 = vld [vmem:[#allocation5 + $0x1b8] sm:$0xff]  ;;  %v1153_v10 = vpack.c.bf16 %v395_v7, %v394_v6  ;;  %v397_v13 = vld [vmem:[#allocation5 + $0xc8] sm:$0xff]  ;;  %v428_v14 = vld [vmem:[#allocation5 + $0x1c0] sm:$0xff] }
  0x6d   : > { %v1201_v11 = vpack.c.bf16 %v427_v9, %v426_v8  ;;  %v429_v15 = vld [vmem:[#allocation5 + $0x1c8] sm:$0xff]  ;;  %v1156_v16 = vpack.c.bf16 %v397_v13, %v396_v12  ;;  %v398_v18 = vld [vmem:[#allocation5 + $0xd0] sm:$0xff]  ;;  %v399_v19 = vld [vmem:[#allocation5 + $0xd8] sm:$0xff] }
  0x6e   : > { %1133 = vmatpush1.bf16.msra.mxu0 %v1132_v29  ;;  %v1204_v17 = vpack.c.bf16 %v429_v15, %v428_v14  ;;  %v430_v20 = vld [vmem:[#allocation5 + $0x1d0] sm:$0xff]  ;;  %v431_v21 = vld [vmem:[#allocation5 + $0x1d8] sm:$0xff]  ;;  %v1159_v22 = vpack.c.bf16 %v399_v19, %v398_v18  ;;  %v400_v24 = vld [vmem:[#allocation5 + $0xe0] sm:$0xff] }
  0x6f   : > { %1181 = vmatpush1.bf16.msra.mxu1 %v1180_v30  ;;  %1134 = vmatprep.subr.bf16.mxu0 %v1448_v0  ;;  %v1207_v23 = vpack.c.bf16 %v431_v21, %v430_v20  ;;  %v401_v25 = vld [vmem:[#allocation5 + $0xe8] sm:$0xff]  ;;  %v432_v26 = vld [vmem:[#allocation5 + $0x1e0] sm:$0xff]  ;;  %v402_v30 = vld [vmem:[#allocation5 + $0xf0] sm:$0xff] }
  0x70   : > { %1182 = vmatprep.subr.bf16.mxu1 %v1448_v0  ;;  %v433_v27 = vld [vmem:[#allocation5 + $0x1e8] sm:$0xff]  ;;  %v1162_v28 = vpack.c.bf16 %v401_v25, %v400_v24  ;;  %v403_v31 = vld [vmem:[#allocation5 + $0xf8] sm:$0xff]  ;;  %v434_v32 = vld [vmem:[#allocation5 + $0x1f0] sm:$0xff] }
  0x71   : > { %v1210_v29 = vpack.c.bf16 %v433_v27, %v432_v26  ;;  %v435_v33 = vld [vmem:[#allocation5 + $0x1f8] sm:$0xff]  ;;  %v1165_v34 = vpack.c.bf16 %v403_v31, %v402_v30  ;;  %v244_v37 = vld [vmem:[%s1623_s24 + $0x10] sm:$0xff]  ;;  %v247_v38 = vld [vmem:[%s1623_s24 + $0x28] sm:$0xff] }
  0x72   : > { %1136 = vmatpush1.bf16.msra.mxu0 %v1135_v35  ;;  %v1213_v35 = vpack.c.bf16 %v435_v33, %v434_v32  ;;  %v249_v39 = vld [vmem:[%s1623_s24 + $0x38] sm:$0xff]  ;;  %v246_v40 = vld [vmem:[%s1623_s24 + $0x20] sm:$0xff]  ;;  %v248_v41 = vld [vmem:[%s1623_s24 + $0x30] sm:$0xff] }
  0x73   : > { %1184 = vmatpush1.bf16.msra.mxu1 %v1183_v36  ;;  %1137 = vmatprep.subr.bf16.mxu0 %v1448_v0  ;;  %v242_v36 = vld [vmem:[%s1623_s24] sm:$0xff]  ;;  %v251_v42 = vld [vmem:[%s1623_s24 + $0x48] sm:$0xff]  ;;  %v257_v46 = vld [vmem:[%s1623_s24 + $0x78] sm:$0xff] }
  0x74   : > { %1185 = vmatprep.subr.bf16.mxu1 %v1448_v0  ;;  %v255_v45 = vld [vmem:[%s1623_s24 + $0x68] sm:$0xff]  ;;  %v254_v47 = vld [vmem:[%s1623_s24 + $0x60] sm:$0xff]  ;;  %v256_v48 = vld [vmem:[%s1623_s24 + $0x70] sm:$0xff] }
  0x75   : > { %v258_v51 = vld [vmem:[%s1623_s24 + $0x80] sm:$0xff]  ;;  %v260_v52 = vld [vmem:[%s1623_s24 + $0x90] sm:$0xff]  ;;  %v263_v53 = vld [vmem:[%s1623_s24 + $0xa8] sm:$0xff] }
  0x76   : > { %1139 = vmatpush1.bf16.msra.mxu0 %v1138_v43  ;;  %v250_v43 = vld [vmem:[%s1623_s24 + $0x40] sm:$0xff]  ;;  %v265_v54 = vld [vmem:[%s1623_s24 + $0xb8] sm:$0xff]  ;;  %v267_v57 = vld [vmem:[%s1623_s24 + $0xc8] sm:$0xff] }
  0x77   : > { %1187 = vmatpush1.bf16.msra.mxu1 %v1186_v44  ;;  %1140 = vmatprep.subr.bf16.mxu0 %v1448_v0  ;;  %v252_v44 = vld [vmem:[%s1623_s24 + $0x50] sm:$0xff]  ;;  %v269_v58 = vld [vmem:[%s1623_s24 + $0xd8] sm:$0xff]  ;;  %v266_v59 = vld [vmem:[%s1623_s24 + $0xc0] sm:$0xff] }
  0x78   : > { %1188 = vmatprep.subr.bf16.mxu1 %v1448_v0  ;;  %v268_v60 = vld [vmem:[%s1623_s24 + $0xd0] sm:$0xff]  ;;  %v270_v63 = vld [vmem:[%s1623_s24 + $0xe0] sm:$0xff]  ;;  %v275_v2 = vld [vmem:[%s1623_s24 + $0x108] sm:$0xff] }
  0x79   : > { %v272_v1 = vld [vmem:[%s1623_s24 + $0xf0] sm:$0xff]  ;;  %v277_v3 = vld [vmem:[%s1623_s24 + $0x118] sm:$0xff]  ;;  %v279_v6 = vld [vmem:[%s1623_s24 + $0x128] sm:$0xff] }
  0x7a   : > { %1142 = vmatpush1.bf16.msra.mxu0 %v1141_v49  ;;  %v259_v49 = vld [vmem:[%s1623_s24 + $0x88] sm:$0xff]  ;;  %v281_v7 = vld [vmem:[%s1623_s24 + $0x138] sm:$0xff]  ;;  %v278_v8 = vld [vmem:[%s1623_s24 + $0x120] sm:$0xff] }
  0x7b   : > { %1190 = vmatpush1.bf16.msra.mxu1 %v1189_v50  ;;  %1143 = vmatprep.subr.bf16.mxu0 %v1448_v0  ;;  %v261_v50 = vld [vmem:[%s1623_s24 + $0x98] sm:$0xff]  ;;  %v280_v9 = vld [vmem:[%s1623_s24 + $0x130] sm:$0xff]  ;;  %v282_v12 = vld [vmem:[%s1623_s24 + $0x140] sm:$0xff] }
  0x7c   : > { %1191 = vmatprep.subr.bf16.mxu1 %v1448_v0  ;;  %v284_v13 = vld [vmem:[%s1623_s24 + $0x150] sm:$0xff]  ;;  %v287_v14 = vld [vmem:[%s1623_s24 + $0x168] sm:$0xff]  ;;  %v289_v15 = vld [vmem:[%s1623_s24 + $0x178] sm:$0xff] }
  0x7d   : > { %v291_v18 = vld [vmem:[%s1623_s24 + $0x188] sm:$0xff]  ;;  %v293_v19 = vld [vmem:[%s1623_s24 + $0x198] sm:$0xff]  ;;  %v290_v20 = vld [vmem:[%s1623_s24 + $0x180] sm:$0xff] }
  0x7e   : > { %1145 = vmatpush1.bf16.msra.mxu0 %v1144_v55  ;;  %v262_v55 = vld [vmem:[%s1623_s24 + $0xa0] sm:$0xff]  ;;  %v292_v21 = vld [vmem:[%s1623_s24 + $0x190] sm:$0xff]  ;;  %v299_v26 = vld [vmem:[%s1623_s24 + $0x1c8] sm:$0xff] }
  0x7f   : > { %1193 = vmatpush1.bf16.msra.mxu1 %v1192_v56  ;;  %1146 = vmatprep.subr.bf16.mxu0 %v1448_v0  ;;  %v264_v56 = vld [vmem:[%s1623_s24 + $0xb0] sm:$0xff]  ;;  %v294_v24 = vld [vmem:[%s1623_s24 + $0x1a0] sm:$0xff]  ;;  %v301_v27 = vld [vmem:[%s1623_s24 + $0x1d8] sm:$0xff] }
  0x80   : > { %1194 = vmatprep.subr.bf16.mxu1 %v1448_v0  ;;  %v296_v25 = vld [vmem:[%s1623_s24 + $0x1b0] sm:$0xff]  ;;  %v303_v30 = vld [vmem:[%s1623_s24 + $0x1e8] sm:$0xff]  ;;  %v305_v31 = vld [vmem:[%s1623_s24 + $0x1f8] sm:$0xff] }
  0x81   : > { %v302_v32 = vld [vmem:[%s1623_s24 + $0x1e0] sm:$0xff]  ;;  %v304_v33 = vld [vmem:[%s1623_s24 + $0x1f0] sm:$0xff] }
  0x82   : > { %1148 = vmatpush1.bf16.msra.mxu0 %v1147_v61  ;;  %v271_v61 = vld [vmem:[%s1623_s24 + $0xe8] sm:$0xff] }
  0x83   : > { %1196 = vmatpush1.bf16.msra.mxu1 %v1195_v62  ;;  %1149 = vmatprep.subr.bf16.mxu0 %v1448_v0  ;;  %v273_v62 = vld [vmem:[%s1623_s24 + $0xf8] sm:$0xff] }
  0x84   : > { %1197 = vmatprep.subr.bf16.mxu1 %v1448_v0 }
  0x86   : > { %1151 = vmatpush1.bf16.msra.mxu0 %v1150_v4  ;;  %v274_v4 = vld [vmem:[%s1623_s24 + $0x100] sm:$0xff] }
  0x87   : > { %1199 = vmatpush1.bf16.msra.mxu1 %v1198_v5  ;;  %1152 = vmatprep.subr.bf16.mxu0 %v1448_v0  ;;  %v276_v5 = vld [vmem:[%s1623_s24 + $0x110] sm:$0xff] }
  0x88   : > { %1200 = vmatprep.subr.bf16.mxu1 %v1448_v0 }
  0x8a   : > { %1154 = vmatpush1.bf16.msra.mxu0 %v1153_v10  ;;  %v283_v10 = vld [vmem:[%s1623_s24 + $0x148] sm:$0xff] }
  0x8b   : > { %1202 = vmatpush1.bf16.msra.mxu1 %v1201_v11  ;;  %1155 = vmatprep.subr.bf16.mxu0 %v1448_v0  ;;  %v285_v11 = vld [vmem:[%s1623_s24 + $0x158] sm:$0xff] }
  0x8c   : > { %1203 = vmatprep.subr.bf16.mxu1 %v1448_v0 }
  0x8e   : > { %1157 = vmatpush1.bf16.msra.mxu0 %v1156_v16  ;;  %v286_v16 = vld [vmem:[%s1623_s24 + $0x160] sm:$0xff] }
  0x8f   : > { %1205 = vmatpush1.bf16.msra.mxu1 %v1204_v17  ;;  %1158 = vmatprep.subr.bf16.mxu0 %v1448_v0  ;;  %v288_v17 = vld [vmem:[%s1623_s24 + $0x170] sm:$0xff] }
  0x90   : > { %1206 = vmatprep.subr.bf16.mxu1 %v1448_v0 }
  0x92   : > { %1160 = vmatpush1.bf16.msra.mxu0 %v1159_v22  ;;  %v295_v22 = vld [vmem:[%s1623_s24 + $0x1a8] sm:$0xff] }
  0x93   : > { %1208 = vmatpush1.bf16.msra.mxu1 %v1207_v23  ;;  %1161 = vmatprep.subr.bf16.mxu0 %v1448_v0  ;;  %v297_v23 = vld [vmem:[%s1623_s24 + $0x1b8] sm:$0xff] }
  0x94   : > { %1209 = vmatprep.subr.bf16.mxu1 %v1448_v0 }
  0x96   : > { %1163 = vmatpush1.bf16.msra.mxu0 %v1162_v28  ;;  %v298_v28 = vld [vmem:[%s1623_s24 + $0x1c0] sm:$0xff] }
  0x97   : > { %1211 = vmatpush1.bf16.msra.mxu1 %v1210_v29  ;;  %1164 = vmatprep.subr.bf16.mxu0 %v1448_v0  ;;  %v300_v29 = vld [vmem:[%s1623_s24 + $0x1d0] sm:$0xff] }
  0x98   : > { %1212 = vmatprep.subr.bf16.mxu1 %v1448_v0  ;;  %v253_v0 = vld [vmem:[%s1623_s24 + $0x58] sm:$0xff] }
  0x9a   : > { %1166 = vmatpush1.bf16.msra.mxu0 %v1165_v34  ;;  %v307_v34 = vld [vmem:[%s1623_s24 + $0x208] sm:$0xff] }
  0x9b   : > { %1214 = vmatpush1.bf16.msra.mxu1 %v1213_v35  ;;  %v309_v35 = vld [vmem:[%s1623_s24 + $0x218] sm:$0xff] }
  0x9d   : > { %533 = vmatmul.mubr.f32.vlgmr.msra.gmra.mrb[0].mxu0 %v242_v36  ;;  %v306_v36 = vld [vmem:[%s1623_s24 + $0x200] sm:$0xff] }
  0x9e   : > { %758 = vmatmul.mubr.f32.vlgmr.msra.gmra.mrb[0].mxu1 %v244_v37  ;;  %537 = vmatprep.mubr.f32.mxu0 %v247_v38  ;;  %v308_v37 = vld [vmem:[%s1623_s24 + $0x210] sm:$0xff]  ;;  %v311_v38 = vld [vmem:[%s1623_s24 + $0x228] sm:$0xff] }
  0x9f   : > { %762 = vmatprep.mubr.f32.mxu1 %v249_v39  ;;  %v313_v39 = vld [vmem:[%s1623_s24 + $0x238] sm:$0xff] }
  0xa1   : > { %538 = vmatmul.mubr.f32.gmra.mrb[2].mxu0 %v246_v40  ;;  %v310_v40 = vld [vmem:[%s1623_s24 + $0x220] sm:$0xff] }
  0xa2   : > { %763 = vmatmul.mubr.f32.gmra.mrb[2].mxu1 %v248_v41  ;;  %542 = vmatprep.mubr.f32.mxu0 %v251_v42  ;;  %v312_v41 = vld [vmem:[%s1623_s24 + $0x230] sm:$0xff]  ;;  %v315_v42 = vld [vmem:[%s1623_s24 + $0x248] sm:$0xff] }
  0xa3   : > { %767 = vmatprep.mubr.f32.mxu1 %v253_v0  ;;  %v317_v0 = vld [vmem:[%s1623_s24 + $0x258] sm:$0xff] }
  0xa5   : > { %543 = vmatmul.mubr.f32.gmra.mrb[4].mxu0 %v250_v43  ;;  %v314_v43 = vld [vmem:[%s1623_s24 + $0x240] sm:$0xff] }
  0xa6   : > { %768 = vmatmul.mubr.f32.gmra.mrb[4].mxu1 %v252_v44  ;;  %547 = vmatprep.mubr.f32.mxu0 %v255_v45  ;;  %v316_v44 = vld [vmem:[%s1623_s24 + $0x250] sm:$0xff]  ;;  %v319_v45 = vld [vmem:[%s1623_s24 + $0x268] sm:$0xff] }
  0xa7   : > { %772 = vmatprep.mubr.f32.mxu1 %v257_v46  ;;  %v321_v46 = vld [vmem:[%s1623_s24 + $0x278] sm:$0xff] }
  0xa9   : > { %548 = vmatmul.mubr.f32.gmra.mrb[6].mxu0 %v254_v47  ;;  %v318_v47 = vld [vmem:[%s1623_s24 + $0x260] sm:$0xff] }
  0xaa   : > { %773 = vmatmul.mubr.f32.gmra.mrb[6].mxu1 %v256_v48  ;;  %552 = vmatprep.mubr.f32.mxu0 %v259_v49  ;;  %v320_v48 = vld [vmem:[%s1623_s24 + $0x270] sm:$0xff]  ;;  %v323_v49 = vld [vmem:[%s1623_s24 + $0x288] sm:$0xff] }
  0xab   : > { %777 = vmatprep.mubr.f32.mxu1 %v261_v50  ;;  %v325_v50 = vld [vmem:[%s1623_s24 + $0x298] sm:$0xff] }
  0xad   : > { %553 = vmatmul.mubr.f32.gmra.mrb[8].mxu0 %v258_v51  ;;  %v322_v51 = vld [vmem:[%s1623_s24 + $0x280] sm:$0xff] }
  0xae   : > { %778 = vmatmul.mubr.f32.gmra.mrb[8].mxu1 %v260_v52  ;;  %557 = vmatprep.mubr.f32.mxu0 %v263_v53  ;;  %v324_v52 = vld [vmem:[%s1623_s24 + $0x290] sm:$0xff]  ;;  %v327_v53 = vld [vmem:[%s1623_s24 + $0x2a8] sm:$0xff] }
  0xaf   : > { %782 = vmatprep.mubr.f32.mxu1 %v265_v54  ;;  %v329_v54 = vld [vmem:[%s1623_s24 + $0x2b8] sm:$0xff] }
  0xb1   : > { %558 = vmatmul.mubr.f32.gmra.mrb[10].mxu0 %v262_v55  ;;  %v326_v55 = vld [vmem:[%s1623_s24 + $0x2a0] sm:$0xff] }
  0xb2   : > { %783 = vmatmul.mubr.f32.gmra.mrb[10].mxu1 %v264_v56  ;;  %562 = vmatprep.mubr.f32.mxu0 %v267_v57  ;;  %v328_v56 = vld [vmem:[%s1623_s24 + $0x2b0] sm:$0xff]  ;;  %v331_v57 = vld [vmem:[%s1623_s24 + $0x2c8] sm:$0xff] }
  0xb3   : > { %787 = vmatprep.mubr.f32.mxu1 %v269_v58  ;;  %v333_v58 = vld [vmem:[%s1623_s24 + $0x2d8] sm:$0xff] }
  0xb5   : > { %563 = vmatmul.mubr.f32.gmra.mrb[12].mxu0 %v266_v59  ;;  %v330_v59 = vld [vmem:[%s1623_s24 + $0x2c0] sm:$0xff] }
  0xb6   : > { %788 = vmatmul.mubr.f32.gmra.mrb[12].mxu1 %v268_v60  ;;  %567 = vmatprep.mubr.f32.mxu0 %v271_v61  ;;  %v332_v60 = vld [vmem:[%s1623_s24 + $0x2d0] sm:$0xff]  ;;  %v335_v61 = vld [vmem:[%s1623_s24 + $0x2e8] sm:$0xff] }
  0xb7   : > { %792 = vmatprep.mubr.f32.mxu1 %v273_v62  ;;  %v337_v62 = vld [vmem:[%s1623_s24 + $0x2f8] sm:$0xff] }
  0xb9   : > { %568 = vmatmul.mubr.f32.gmra.mrb[14].mxu0 %v270_v63  ;;  %v334_v63 = vld [vmem:[%s1623_s24 + $0x2e0] sm:$0xff] }
  0xba   : > { %793 = vmatmul.mubr.f32.gmra.mrb[14].mxu1 %v272_v1  ;;  %572 = vmatprep.mubr.f32.mxu0 %v275_v2  ;;  %v336_v1 = vld [vmem:[%s1623_s24 + $0x2f0] sm:$0xff]  ;;  %v339_v2 = vld [vmem:[%s1623_s24 + $0x308] sm:$0xff] }
  0xbb   : > { %797 = vmatprep.mubr.f32.mxu1 %v277_v3  ;;  %v341_v3 = vld [vmem:[%s1623_s24 + $0x318] sm:$0xff] }
  0xbd   : > { %573 = vmatmul.mubr.f32.gmra.mrb[16].mxu0 %v274_v4  ;;  %v338_v4 = vld [vmem:[%s1623_s24 + $0x300] sm:$0xff] }
  0xbe   : > { %798 = vmatmul.mubr.f32.gmra.mrb[16].mxu1 %v276_v5  ;;  %577 = vmatprep.mubr.f32.mxu0 %v279_v6  ;;  %v340_v5 = vld [vmem:[%s1623_s24 + $0x310] sm:$0xff]  ;;  %v343_v6 = vld [vmem:[%s1623_s24 + $0x328] sm:$0xff] }
  0xbf   : > { %802 = vmatprep.mubr.f32.mxu1 %v281_v7  ;;  %v345_v7 = vld [vmem:[%s1623_s24 + $0x338] sm:$0xff] }
  0xc1   : > { %578 = vmatmul.mubr.f32.gmra.mrb[18].mxu0 %v278_v8  ;;  %v342_v8 = vld [vmem:[%s1623_s24 + $0x320] sm:$0xff] }
  0xc2   : > { %803 = vmatmul.mubr.f32.gmra.mrb[18].mxu1 %v280_v9  ;;  %582 = vmatprep.mubr.f32.mxu0 %v283_v10  ;;  %v344_v9 = vld [vmem:[%s1623_s24 + $0x330] sm:$0xff]  ;;  %v347_v10 = vld [vmem:[%s1623_s24 + $0x348] sm:$0xff] }
  0xc3   : > { %807 = vmatprep.mubr.f32.mxu1 %v285_v11  ;;  %v349_v11 = vld [vmem:[%s1623_s24 + $0x358] sm:$0xff] }
  0xc5   : > { %583 = vmatmul.mubr.f32.gmra.mrb[20].mxu0 %v282_v12  ;;  %v346_v12 = vld [vmem:[%s1623_s24 + $0x340] sm:$0xff] }
  0xc6   : > { %808 = vmatmul.mubr.f32.gmra.mrb[20].mxu1 %v284_v13  ;;  %587 = vmatprep.mubr.f32.mxu0 %v287_v14  ;;  %v348_v13 = vld [vmem:[%s1623_s24 + $0x350] sm:$0xff]  ;;  %v351_v14 = vld [vmem:[%s1623_s24 + $0x368] sm:$0xff] }
  0xc7   : > { %812 = vmatprep.mubr.f32.mxu1 %v289_v15  ;;  %v353_v15 = vld [vmem:[%s1623_s24 + $0x378] sm:$0xff] }
  0xc9   : > { %588 = vmatmul.mubr.f32.gmra.mrb[22].mxu0 %v286_v16  ;;  %v350_v16 = vld [vmem:[%s1623_s24 + $0x360] sm:$0xff] }
  0xca   : > { %813 = vmatmul.mubr.f32.gmra.mrb[22].mxu1 %v288_v17  ;;  %592 = vmatprep.mubr.f32.mxu0 %v291_v18  ;;  %v352_v17 = vld [vmem:[%s1623_s24 + $0x370] sm:$0xff]  ;;  %v355_v18 = vld [vmem:[%s1623_s24 + $0x388] sm:$0xff] }
  0xcb   : > { %817 = vmatprep.mubr.f32.mxu1 %v293_v19  ;;  %v357_v19 = vld [vmem:[%s1623_s24 + $0x398] sm:$0xff] }
  0xcd   : > { %593 = vmatmul.mubr.f32.gmra.mrb[24].mxu0 %v290_v20  ;;  %v354_v20 = vld [vmem:[%s1623_s24 + $0x380] sm:$0xff] }
  0xce   : > { %818 = vmatmul.mubr.f32.gmra.mrb[24].mxu1 %v292_v21  ;;  %597 = vmatprep.mubr.f32.mxu0 %v295_v22  ;;  %v356_v21 = vld [vmem:[%s1623_s24 + $0x390] sm:$0xff]  ;;  %v359_v22 = vld [vmem:[%s1623_s24 + $0x3a8] sm:$0xff] }
  0xcf   : > { %822 = vmatprep.mubr.f32.mxu1 %v297_v23  ;;  %v361_v23 = vld [vmem:[%s1623_s24 + $0x3b8] sm:$0xff] }
  0xd1   : > { %598 = vmatmul.mubr.f32.gmra.mrb[26].mxu0 %v294_v24  ;;  %v358_v24 = vld [vmem:[%s1623_s24 + $0x3a0] sm:$0xff] }
  0xd2   : > { %823 = vmatmul.mubr.f32.gmra.mrb[26].mxu1 %v296_v25  ;;  %602 = vmatprep.mubr.f32.mxu0 %v299_v26  ;;  %v360_v25 = vld [vmem:[%s1623_s24 + $0x3b0] sm:$0xff]  ;;  %v363_v26 = vld [vmem:[%s1623_s24 + $0x3c8] sm:$0xff] }
  0xd3   : > { %827 = vmatprep.mubr.f32.mxu1 %v301_v27  ;;  %v365_v27 = vld [vmem:[%s1623_s24 + $0x3d8] sm:$0xff] }
  0xd5   : > { %603 = vmatmul.mubr.f32.gmra.mrb[28].mxu0 %v298_v28  ;;  %v362_v28 = vld [vmem:[%s1623_s24 + $0x3c0] sm:$0xff] }
  0xd6   : > { %828 = vmatmul.mubr.f32.gmra.mrb[28].mxu1 %v300_v29  ;;  %607 = vmatprep.mubr.f32.mxu0 %v303_v30  ;;  %v364_v29 = vld [vmem:[%s1623_s24 + $0x3d0] sm:$0xff]  ;;  %v367_v30 = vld [vmem:[%s1623_s24 + $0x3e8] sm:$0xff] }
  0xd7   : > { %832 = vmatprep.mubr.f32.mxu1 %v305_v31  ;;  %v369_v31 = vld [vmem:[%s1623_s24 + $0x3f8] sm:$0xff] }
  0xd9   : > { %608 = vmatmul.mubr.f32.gmra.mrb[30].mxu0 %v302_v32  ;;  %v366_v32 = vld [vmem:[%s1623_s24 + $0x3e0] sm:$0xff] }
  0xda   : > { %833 = vmatmul.mubr.f32.gmra.mrb[30].mxu1 %v304_v33  ;;  %612 = vmatprep.mubr.f32.mxu0 %v307_v34  ;;  %v368_v33 = vld [vmem:[%s1623_s24 + $0x3f0] sm:$0xff] }
  0xdb   : > { %837 = vmatprep.mubr.f32.mxu1 %v309_v35 }
  0xdd   : > { %613 = vmatmul.mubr.f32.gmra.mrb[32].mxu0 %v306_v36 }
  0xde   : > { %838 = vmatmul.mubr.f32.gmra.mrb[32].mxu1 %v308_v37  ;;  %617 = vmatprep.mubr.f32.mxu0 %v311_v38 }
  0xdf   : > { %842 = vmatprep.mubr.f32.mxu1 %v313_v39 }
  0xe1   : > { %618 = vmatmul.mubr.f32.gmra.mrb[34].mxu0 %v310_v40 }
  0xe2   : > { %843 = vmatmul.mubr.f32.gmra.mrb[34].mxu1 %v312_v41  ;;  %622 = vmatprep.mubr.f32.mxu0 %v315_v42 }
  0xe3   : > { %847 = vmatprep.mubr.f32.mxu1 %v317_v0 }
  0xe5   : > { %623 = vmatmul.mubr.f32.gmra.mrb[36].mxu0 %v314_v43 }
  0xe6   : > { %848 = vmatmul.mubr.f32.gmra.mrb[36].mxu1 %v316_v44  ;;  %627 = vmatprep.mubr.f32.mxu0 %v319_v45 }
  0xe7   : > { %852 = vmatprep.mubr.f32.mxu1 %v321_v46 }
  0xe9   : > { %628 = vmatmul.mubr.f32.gmra.mrb[38].mxu0 %v318_v47 }
  0xea   : > { %853 = vmatmul.mubr.f32.gmra.mrb[38].mxu1 %v320_v48  ;;  %632 = vmatprep.mubr.f32.mxu0 %v323_v49 }
  0xeb   : > { %857 = vmatprep.mubr.f32.mxu1 %v325_v50 }
  0xed   : > { %633 = vmatmul.mubr.f32.gmra.mrb[40].mxu0 %v322_v51 }
  0xee   : > { %858 = vmatmul.mubr.f32.gmra.mrb[40].mxu1 %v324_v52  ;;  %637 = vmatprep.mubr.f32.mxu0 %v327_v53 }
  0xef   : > { %862 = vmatprep.mubr.f32.mxu1 %v329_v54 }
  0xf1   : > { %638 = vmatmul.mubr.f32.gmra.mrb[42].mxu0 %v326_v55 }
  0xf2   : > { %863 = vmatmul.mubr.f32.gmra.mrb[42].mxu1 %v328_v56  ;;  %642 = vmatprep.mubr.f32.mxu0 %v331_v57 }
  0xf3   : > { %867 = vmatprep.mubr.f32.mxu1 %v333_v58 }
  0xf5   : > { %643 = vmatmul.mubr.f32.gmra.mrb[44].mxu0 %v330_v59 }
  0xf6   : > { %868 = vmatmul.mubr.f32.gmra.mrb[44].mxu1 %v332_v60  ;;  %647 = vmatprep.mubr.f32.mxu0 %v335_v61 }
  0xf7   : > { %872 = vmatprep.mubr.f32.mxu1 %v337_v62 }
  0xf9   : > { %648 = vmatmul.mubr.f32.gmra.mrb[46].mxu0 %v334_v63 }
  0xfa   : > { %873 = vmatmul.mubr.f32.gmra.mrb[46].mxu1 %v336_v1  ;;  %652 = vmatprep.mubr.f32.mxu0 %v339_v2 }
  0xfb   : > { %877 = vmatprep.mubr.f32.mxu1 %v341_v3 }
  0xfd   : > { %653 = vmatmul.mubr.f32.gmra.mrb[48].mxu0 %v338_v4 }
  0xfe   : > { %878 = vmatmul.mubr.f32.gmra.mrb[48].mxu1 %v340_v5  ;;  %657 = vmatprep.mubr.f32.mxu0 %v343_v6 }
  0xff   : > { %882 = vmatprep.mubr.f32.mxu1 %v345_v7 }
 0x101   : > { %658 = vmatmul.mubr.f32.gmra.mrb[50].mxu0 %v342_v8 }
 0x102   : > { %883 = vmatmul.mubr.f32.gmra.mrb[50].mxu1 %v344_v9  ;;  %662 = vmatprep.mubr.f32.mxu0 %v347_v10 }
 0x103   : > { %887 = vmatprep.mubr.f32.mxu1 %v349_v11 }
 0x105   : > { %663 = vmatmul.mubr.f32.gmra.mrb[52].mxu0 %v346_v12 }
 0x106   : > { %888 = vmatmul.mubr.f32.gmra.mrb[52].mxu1 %v348_v13  ;;  %667 = vmatprep.mubr.f32.mxu0 %v351_v14 }
 0x107   : > { %892 = vmatprep.mubr.f32.mxu1 %v353_v15 }
 0x109   : > { %668 = vmatmul.mubr.f32.gmra.mrb[54].mxu0 %v350_v16 }
 0x10a   : > { %893 = vmatmul.mubr.f32.gmra.mrb[54].mxu1 %v352_v17  ;;  %672 = vmatprep.mubr.f32.mxu0 %v355_v18 }
 0x10b   : > { %897 = vmatprep.mubr.f32.mxu1 %v357_v19 }
 0x10d   : > { %673 = vmatmul.mubr.f32.gmra.mrb[56].mxu0 %v354_v20 }
 0x10e   : > { %898 = vmatmul.mubr.f32.gmra.mrb[56].mxu1 %v356_v21  ;;  %677 = vmatprep.mubr.f32.mxu0 %v359_v22 }
 0x10f   : > { %902 = vmatprep.mubr.f32.mxu1 %v361_v23 }
 0x111   : > { %678 = vmatmul.mubr.f32.gmra.mrb[58].mxu0 %v358_v24 }
 0x112   : > { %903 = vmatmul.mubr.f32.gmra.mrb[58].mxu1 %v360_v25  ;;  %682 = vmatprep.mubr.f32.mxu0 %v363_v26 }
 0x113   : > { %907 = vmatprep.mubr.f32.mxu1 %v365_v27 }
 0x115   : > { %683 = vmatmul.mubr.f32.gmra.mrb[60].mxu0 %v362_v28 }
 0x116   : > { %908 = vmatmul.mubr.f32.gmra.mrb[60].mxu1 %v364_v29  ;;  %687 = vmatprep.mubr.f32.mxu0 %v367_v30 }
 0x117   : > { %912 = vmatprep.mubr.f32.mxu1 %v369_v31 }
 0x119   : > { %688 = vmatmul.mubr.f32.gmra.mrb[62].mxu0 %v366_v32 }
 0x11a   : > { %913 = vmatmul.mubr.f32.gmra.mrb[62].mxu1 %v368_v33 }
 0x170   : > { %v534_v34 = vpop.f32.mrb[0].mxu0 }
 0x171   : > { %v759_v35 = vpop.f32.mrb[0].mxu1  ;;  %v536_v36 = vpop.f32.mrb[1].mxu0 }
 0x172   : > { %v760_v37 = vadd.f32 %v759_v35, %v534_v34  ;;  %v761_v38 = vpop.f32.mrb[1].mxu1 }
 0x174   : > { %v539_v39 = vpop.f32.mrb[2].mxu0  ;;  %950 = vst [vmem:[%s1794_s19] sm:$0xff] %v760_v37 }
 0x175   : > { %v764_v40 = vpop.f32.mrb[2].mxu1  ;;  %v541_v41 = vpop.f32.mrb[3].mxu0 }
 0x176   : > { %v765_v42 = vadd.f32 %v764_v40, %v539_v39  ;;  %v766_v0 = vpop.f32.mrb[3].mxu1 }
 0x178   : > { %v544_v43 = vpop.f32.mrb[4].mxu0  ;;  %951 = vst [vmem:[%s1794_s19 + $0x8] sm:$0xff] %v765_v42 }
 0x179   : > { %v769_v44 = vpop.f32.mrb[4].mxu1  ;;  %v546_v45 = vpop.f32.mrb[5].mxu0 }
 0x17a   : > { %v770_v46 = vadd.f32 %v769_v44, %v544_v43  ;;  %v771_v47 = vpop.f32.mrb[5].mxu1 }
 0x17c   : > { %v549_v48 = vpop.f32.mrb[6].mxu0  ;;  %952 = vst [vmem:[%s1794_s19 + $0x10] sm:$0xff] %v770_v46 }
 0x17d   : > { %v774_v49 = vpop.f32.mrb[6].mxu1  ;;  %v551_v50 = vpop.f32.mrb[7].mxu0 }
 0x17e   : > { %v775_v51 = vadd.f32 %v774_v49, %v549_v48  ;;  %v776_v52 = vpop.f32.mrb[7].mxu1 }
 0x180   : > { %v554_v53 = vpop.f32.mrb[8].mxu0  ;;  %953 = vst [vmem:[%s1794_s19 + $0x18] sm:$0xff] %v775_v51 }
 0x181   : > { %v779_v54 = vpop.f32.mrb[8].mxu1  ;;  %v556_v55 = vpop.f32.mrb[9].mxu0 }
 0x182   : > { %v780_v56 = vadd.f32 %v779_v54, %v554_v53  ;;  %v781_v57 = vpop.f32.mrb[9].mxu1 }
 0x184   : > { %v559_v58 = vpop.f32.mrb[10].mxu0  ;;  %954 = vst [vmem:[%s1794_s19 + $0x20] sm:$0xff] %v780_v56 }
 0x185   : > { %v784_v59 = vpop.f32.mrb[10].mxu1  ;;  %v561_v60 = vpop.f32.mrb[11].mxu0 }
 0x186   : > { %v785_v61 = vadd.f32 %v784_v59, %v559_v58  ;;  %v786_v62 = vpop.f32.mrb[11].mxu1 }
 0x188   : > { %v564_v63 = vpop.f32.mrb[12].mxu0  ;;  %955 = vst [vmem:[%s1794_s19 + $0x28] sm:$0xff] %v785_v61 }
 0x189   : > { %v789_v1 = vpop.f32.mrb[12].mxu1  ;;  %v566_v2 = vpop.f32.mrb[13].mxu0 }
 0x18a   : > { %v790_v3 = vadd.f32 %v789_v1, %v564_v63  ;;  %v791_v4 = vpop.f32.mrb[13].mxu1 }
 0x18c   : > { %v569_v5 = vpop.f32.mrb[14].mxu0  ;;  %956 = vst [vmem:[%s1794_s19 + $0x30] sm:$0xff] %v790_v3 }
 0x18d   : > { %v794_v6 = vpop.f32.mrb[14].mxu1  ;;  %v571_v7 = vpop.f32.mrb[15].mxu0 }
 0x18e   : > { %v795_v8 = vadd.f32 %v794_v6, %v569_v5  ;;  %v796_v9 = vpop.f32.mrb[15].mxu1 }
 0x190   : > { %v574_v10 = vpop.f32.mrb[16].mxu0  ;;  %957 = vst [vmem:[%s1794_s19 + $0x38] sm:$0xff] %v795_v8 }
 0x191   : > { %v799_v11 = vpop.f32.mrb[16].mxu1  ;;  %v576_v12 = vpop.f32.mrb[17].mxu0 }
 0x192   : > { %v800_v13 = vadd.f32 %v799_v11, %v574_v10  ;;  %v801_v14 = vpop.f32.mrb[17].mxu1 }
 0x194   : > { %v579_v15 = vpop.f32.mrb[18].mxu0  ;;  %958 = vst [vmem:[%s1794_s19 + $0x40] sm:$0xff] %v800_v13 }
 0x195   : > { %v804_v16 = vpop.f32.mrb[18].mxu1  ;;  %v581_v17 = vpop.f32.mrb[19].mxu0 }
 0x196   : > { %v805_v18 = vadd.f32 %v804_v16, %v579_v15  ;;  %v806_v19 = vpop.f32.mrb[19].mxu1 }
 0x198   : > { %v584_v20 = vpop.f32.mrb[20].mxu0  ;;  %959 = vst [vmem:[%s1794_s19 + $0x48] sm:$0xff] %v805_v18 }
 0x199   : > { %v809_v21 = vpop.f32.mrb[20].mxu1  ;;  %v586_v22 = vpop.f32.mrb[21].mxu0 }
 0x19a   : > { %v810_v23 = vadd.f32 %v809_v21, %v584_v20  ;;  %v811_v24 = vpop.f32.mrb[21].mxu1 }
 0x19c   : > { %v589_v25 = vpop.f32.mrb[22].mxu0  ;;  %960 = vst [vmem:[%s1794_s19 + $0x50] sm:$0xff] %v810_v23 }
 0x19d   : > { %v814_v26 = vpop.f32.mrb[22].mxu1  ;;  %v591_v27 = vpop.f32.mrb[23].mxu0 }
 0x19e   : > { %v815_v28 = vadd.f32 %v814_v26, %v589_v25  ;;  %v816_v29 = vpop.f32.mrb[23].mxu1 }
 0x1a0   : > { %v594_v30 = vpop.f32.mrb[24].mxu0  ;;  %961 = vst [vmem:[%s1794_s19 + $0x58] sm:$0xff] %v815_v28 }
 0x1a1   : > { %v819_v31 = vpop.f32.mrb[24].mxu1  ;;  %v596_v32 = vpop.f32.mrb[25].mxu0 }
 0x1a2   : > { %v820_v33 = vadd.f32 %v819_v31, %v594_v30  ;;  %v821_v34 = vpop.f32.mrb[25].mxu1 }
 0x1a4   : > { %v599_v35 = vpop.f32.mrb[26].mxu0  ;;  %962 = vst [vmem:[%s1794_s19 + $0x60] sm:$0xff] %v820_v33 }
 0x1a5   : > { %v824_v36 = vpop.f32.mrb[26].mxu1  ;;  %v601_v37 = vpop.f32.mrb[27].mxu0 }
 0x1a6   : > { %v825_v38 = vadd.f32 %v824_v36, %v599_v35  ;;  %v826_v39 = vpop.f32.mrb[27].mxu1 }
 0x1a8   : > { %v604_v40 = vpop.f32.mrb[28].mxu0  ;;  %963 = vst [vmem:[%s1794_s19 + $0x68] sm:$0xff] %v825_v38 }
 0x1a9   : > { %v829_v41 = vpop.f32.mrb[28].mxu1  ;;  %v606_v42 = vpop.f32.mrb[29].mxu0 }
 0x1aa   : > { %v830_v0 = vadd.f32 %v829_v41, %v604_v40  ;;  %v831_v43 = vpop.f32.mrb[29].mxu1 }
 0x1ac   : > { %v609_v44 = vpop.f32.mrb[30].mxu0  ;;  %964 = vst [vmem:[%s1794_s19 + $0x70] sm:$0xff] %v830_v0 }
 0x1ad   : > { %v834_v45 = vpop.f32.mrb[30].mxu1  ;;  %v611_v46 = vpop.f32.mrb[31].mxu0 }
 0x1ae   : > { %v835_v47 = vadd.f32 %v834_v45, %v609_v44  ;;  %v836_v48 = vpop.f32.mrb[31].mxu1 }
 0x1b0   : > { %v614_v49 = vpop.f32.mrb[32].mxu0  ;;  %965 = vst [vmem:[%s1794_s19 + $0x78] sm:$0xff] %v835_v47 }
 0x1b1   : > { %v839_v50 = vpop.f32.mrb[32].mxu1  ;;  %v616_v51 = vpop.f32.mrb[33].mxu0 }
 0x1b2   : > { %v840_v52 = vadd.f32 %v839_v50, %v614_v49  ;;  %v841_v53 = vpop.f32.mrb[33].mxu1 }
 0x1b4   : > { %v619_v54 = vpop.f32.mrb[34].mxu0  ;;  %966 = vst [vmem:[%s1794_s19 + $0x80] sm:$0xff] %v840_v52 }
 0x1b5   : > { %v844_v55 = vpop.f32.mrb[34].mxu1  ;;  %v621_v56 = vpop.f32.mrb[35].mxu0 }
 0x1b6   : > { %v845_v57 = vadd.f32 %v844_v55, %v619_v54  ;;  %v846_v58 = vpop.f32.mrb[35].mxu1 }
 0x1b8   : > { %v624_v59 = vpop.f32.mrb[36].mxu0  ;;  %967 = vst [vmem:[%s1794_s19 + $0x88] sm:$0xff] %v845_v57 }
 0x1b9   : > { %v849_v60 = vpop.f32.mrb[36].mxu1  ;;  %v626_v61 = vpop.f32.mrb[37].mxu0 }
 0x1ba   : > { %v850_v62 = vadd.f32 %v849_v60, %v624_v59  ;;  %v851_v63 = vpop.f32.mrb[37].mxu1 }
 0x1bc   : > { %v629_v1 = vpop.f32.mrb[38].mxu0  ;;  %968 = vst [vmem:[%s1794_s19 + $0x90] sm:$0xff] %v850_v62 }
 0x1bd   : > { %v854_v2 = vpop.f32.mrb[38].mxu1  ;;  %v631_v3 = vpop.f32.mrb[39].mxu0 }
 0x1be   : > { %v855_v4 = vadd.f32 %v854_v2, %v629_v1  ;;  %v856_v5 = vpop.f32.mrb[39].mxu1 }
 0x1c0   : > { %v634_v6 = vpop.f32.mrb[40].mxu0  ;;  %969 = vst [vmem:[%s1794_s19 + $0x98] sm:$0xff] %v855_v4 }
 0x1c1   : > { %v859_v7 = vpop.f32.mrb[40].mxu1  ;;  %v636_v8 = vpop.f32.mrb[41].mxu0 }
 0x1c2   : > { %v860_v9 = vadd.f32 %v859_v7, %v634_v6  ;;  %v861_v10 = vpop.f32.mrb[41].mxu1 }
 0x1c4   : > { %v639_v11 = vpop.f32.mrb[42].mxu0  ;;  %970 = vst [vmem:[%s1794_s19 + $0xa0] sm:$0xff] %v860_v9 }
 0x1c5   : > { %v864_v12 = vpop.f32.mrb[42].mxu1  ;;  %v641_v13 = vpop.f32.mrb[43].mxu0 }
 0x1c6   : > { %v865_v14 = vadd.f32 %v864_v12, %v639_v11  ;;  %v866_v15 = vpop.f32.mrb[43].mxu1 }
 0x1c8   : > { %v644_v16 = vpop.f32.mrb[44].mxu0  ;;  %971 = vst [vmem:[%s1794_s19 + $0xa8] sm:$0xff] %v865_v14 }
 0x1c9   : > { %v869_v17 = vpop.f32.mrb[44].mxu1  ;;  %v646_v18 = vpop.f32.mrb[45].mxu0 }
 0x1ca   : > { %v870_v19 = vadd.f32 %v869_v17, %v644_v16  ;;  %v871_v20 = vpop.f32.mrb[45].mxu1 }
 0x1cc   : > { %v649_v21 = vpop.f32.mrb[46].mxu0  ;;  %972 = vst [vmem:[%s1794_s19 + $0xb0] sm:$0xff] %v870_v19 }
 0x1cd   : > { %v874_v22 = vpop.f32.mrb[46].mxu1  ;;  %v651_v23 = vpop.f32.mrb[47].mxu0 }
 0x1ce   : > { %v875_v24 = vadd.f32 %v874_v22, %v649_v21  ;;  %v876_v25 = vpop.f32.mrb[47].mxu1 }
 0x1d0   : > { %v654_v26 = vpop.f32.mrb[48].mxu0  ;;  %973 = vst [vmem:[%s1794_s19 + $0xb8] sm:$0xff] %v875_v24 }
 0x1d1   : > { %v879_v27 = vpop.f32.mrb[48].mxu1  ;;  %v656_v28 = vpop.f32.mrb[49].mxu0 }
 0x1d2   : > { %v880_v29 = vadd.f32 %v879_v27, %v654_v26  ;;  %v881_v30 = vpop.f32.mrb[49].mxu1 }
 0x1d4   : > { %v659_v31 = vpop.f32.mrb[50].mxu0  ;;  %974 = vst [vmem:[%s1794_s19 + $0xc0] sm:$0xff] %v880_v29 }
 0x1d5   : > { %v884_v32 = vpop.f32.mrb[50].mxu1  ;;  %v661_v33 = vpop.f32.mrb[51].mxu0 }
 0x1d6   : > { %v885_v34 = vadd.f32 %v884_v32, %v659_v31  ;;  %v886_v35 = vpop.f32.mrb[51].mxu1 }
 0x1d8   : > { %v664_v36 = vpop.f32.mrb[52].mxu0  ;;  %975 = vst [vmem:[%s1794_s19 + $0xc8] sm:$0xff] %v885_v34 }
 0x1d9   : > { %v889_v37 = vpop.f32.mrb[52].mxu1  ;;  %v666_v38 = vpop.f32.mrb[53].mxu0 }
 0x1da   : > { %v890_v39 = vadd.f32 %v889_v37, %v664_v36  ;;  %v891_v40 = vpop.f32.mrb[53].mxu1 }
 0x1dc   : > { %v669_v41 = vpop.f32.mrb[54].mxu0  ;;  %976 = vst [vmem:[%s1794_s19 + $0xd0] sm:$0xff] %v890_v39 }
 0x1dd   : > { %v894_v42 = vpop.f32.mrb[54].mxu1  ;;  %v671_v0 = vpop.f32.mrb[55].mxu0 }
 0x1de   : > { %v895_v43 = vadd.f32 %v894_v42, %v669_v41  ;;  %v896_v44 = vpop.f32.mrb[55].mxu1 }
 0x1e0   : > { %v674_v45 = vpop.f32.mrb[56].mxu0  ;;  %977 = vst [vmem:[%s1794_s19 + $0xd8] sm:$0xff] %v895_v43 }
 0x1e1   : > { %v899_v46 = vpop.f32.mrb[56].mxu1  ;;  %v676_v47 = vpop.f32.mrb[57].mxu0 }
 0x1e2   : > { %v900_v48 = vadd.f32 %v899_v46, %v674_v45  ;;  %v901_v49 = vpop.f32.mrb[57].mxu1 }
 0x1e4   : > { %v679_v50 = vpop.f32.mrb[58].mxu0  ;;  %978 = vst [vmem:[%s1794_s19 + $0xe0] sm:$0xff] %v900_v48 }
 0x1e5   : > { %v904_v51 = vpop.f32.mrb[58].mxu1  ;;  %v681_v52 = vpop.f32.mrb[59].mxu0 }
 0x1e6   : > { %v905_v53 = vadd.f32 %v904_v51, %v679_v50  ;;  %v906_v54 = vpop.f32.mrb[59].mxu1 }
 0x1e8   : > { %v684_v55 = vpop.f32.mrb[60].mxu0  ;;  %979 = vst [vmem:[%s1794_s19 + $0xe8] sm:$0xff] %v905_v53 }
 0x1e9   : > { %v909_v56 = vpop.f32.mrb[60].mxu1  ;;  %v686_v57 = vpop.f32.mrb[61].mxu0 }
 0x1ea   : > { %v910_v58 = vadd.f32 %v909_v56, %v684_v55  ;;  %v911_v59 = vpop.f32.mrb[61].mxu1 }
 0x1ec   : > { %v689_v60 = vpop.f32.mrb[62].mxu0  ;;  %980 = vst [vmem:[%s1794_s19 + $0xf0] sm:$0xff] %v910_v58 }
 0x1ed   : > { %v914_v61 = vpop.f32.mrb[62].mxu1  ;;  %v691_v62 = vpop.f32.mrb[63].mxu0 }
 0x1ee   : > { %v915_v63 = vadd.f32 %v914_v61, %v689_v60  ;;  %v916_v1 = vpop.f32.mrb[63].mxu1 }
 0x1f0   : > { %981 = vst [vmem:[%s1794_s19 + $0xf8] sm:$0xff] %v915_v63 }
 0x1f1   : > { %1367 = shalt.err (!%p1364_p5)
}
 0x1f2   : > { %s1368_s3 = scalar_lea.hbm %s1832_s7, 4096  ;;  %s1372_s16 = scalar_lea.hbm %s1886_s2, 8192 }
 0x1f3   : > { %p1369_p9 = scmp.ne.s32.totalorder %s1832_s7, %s1368_s3  ;;  %p1373_p3 = scmp.lt.u32.totalorder %s1832_s7, %s1886_s2 }
 0x1f4   : > { %p1374_p7 = scmp.lt.u32.totalorder %s1372_s16, %s1368_s3  ;;  %p1376_p4 = scmp.lt.u32.totalorder %s1368_s3, %s1832_s7 }
 0x1f5   : > { %p1370_p1 = pnand %p1369_p9, %p1563_p10 }
 0x1f6   : > { %p1375_p13 = por %p1374_p7, %p1373_p3 }
 0x1f7   : > { %p1371_p2 = pneg %p1370_p1 }
 0x1f8   : > { %p1377_p6 = por %p1376_p4, %p1375_p13 }
 0x1fa   : > { %p1378_p8 = pnand %p1377_p6, %p1371_p2 }
 0x1fc   : > { %1381 = shalt.err (!%p1378_p8)
}
 0x1fd   : > { %s1450_s17 = smov 128   ;;  %s1451_s19 = smov 8  }
 0x1fe   : > { %1221 = dma.vmem_to_hbm [thread:$0]  (%p1563_p10), %s1834_s4, 4096, %s1832_s7, %s983_s27, %s1450_s17, %s1450_s17, %s1451_s19  }
 0x1ff PF: > { %s1012_s21 = sand.u32 1, %s1420_s9   ;;  %p1904_p12 = scmp.ne.s32.totalorder %s1894_s20, 0 }
 0x200   : > { %p1905_p11 = scmp.ge.s32.totalorder %s1440_s14, 2  ;;  %s1013_s5 = scalar_lea.sflag [#allocation4], %s1012_s21 }
 0x202   : > { %p1232_p0 = pnand %p1905_p11, %p1904_p12 }
 0x204   : > { %1415 = dma.done.wait (!%p1232_p0), %s1013_s5, 4096  }
 0x205   : > { %1417 = vsyncadd (!%p1232_p0), %s1013_s5, 4294963200  ;;  %s19_s14 = sadd.s32 1, %s1440_s14   ;;  %s1906_s9 = smov %s1424_s10 }
 0x206   : > { %p16_p5 = scmp.ge.s32.totalorder %s19_s14, 4   ;;  %s1907_s10 = smov %s1428_s11 }
 0x207   : > { %s1908_s11 = smov %s1572_s28  ;;  %s1909_s12 = smov %s1436_s13 }
 0x208   : > { %s1910_s13 = smov %s1912_s25  ;;  %18 = sbr.rel (!%p16_p5) target bundleno = 7 (0x7), region = 82 }
 0x20f   :  { %1018 = vsyncpa [#allocation3], 1 }
 0x210   :  { %1020 = vsyncpa [#allocation3 + $0x1], 1 }
 0x211   :  { %1021 = vsyncpa [#allocation6], 1 }
 0x212   :  { %1022 = vsyncpa [#allocation4], 1 }
 0x213   :  { %1024 = vsyncpa [#allocation4 + $0x1], 1 }

</bundles_post_ra>
